<compile_context>
chip_gen: v5e
topology: v5e:2x2
jax: 0.10.0
libtpu: 0.0.40
codegen_flags: <defaults>
</compile_context>

<pallas_src>
import functools

import jax
import jax.numpy as jnp
from jax.experimental import pallas as pl
from jax.experimental.pallas import tpu as pltpu


def _round_up(a, m):
    return (a + m - 1) // m * m


def _patch_embed_kernel(p_ref, w_ref, b_ref, o_ref):
    # p_ref: (tm, K)  patch tile (compute dtype, e.g. bf16), pipelined
    # w_ref: (K, E)   flattened conv weight, VMEM-resident
    # b_ref: (1, E)   bias (f32), VMEM-resident
    # o_ref: (tm, E)  output tile (out_dtype)
    acc = jnp.dot(p_ref[...], w_ref[...], preferred_element_type=jnp.float32)
    o_ref[...] = (acc + b_ref[...]).astype(o_ref.dtype)


def patch_embed(x, weight, bias, patch_size, *, tm=1024,
                compute_dtype=jnp.bfloat16, out_dtype=jnp.float32,
                vmem_tile_budget_bytes=30 << 20):
    """x: (N, C, H, W); weight: (E, C, p, p); bias: (E,).

    Returns (N, n_patches, E) in `out_dtype` — same semantics as the PyTorch
    PatchEmbed.forward (Conv2d with kernel=stride=p, then flatten+transpose).
    NOTE: the default bf16 compute path is intentionally lower precision than
    PyTorch's f32 Conv2d; pass compute_dtype=jnp.float32 for bit-level parity.
    """
    N, C, H, W = x.shape
    E = weight.shape[0]
    p = patch_size
    Hp, Wp = H // p, W // p
    n_patches = Hp * Wp
    K = C * p * p
    M = N * n_patches

    in_bytes = jnp.dtype(compute_dtype).itemsize
    out_bytes = jnp.dtype(out_dtype).itemsize

    # ---- glue: cast FIRST (halves relayout bytes), then patch extraction ----
    # Per-patch feature order (c, kh, kw) matches the conv-weight flatten.
    xc = x.astype(compute_dtype)
    patches = xc.reshape(N, C, Hp, p, Wp, p)
    patches = patches.transpose(0, 2, 4, 1, 3, 5)        # (N, Hp, Wp, C, p, p)
    patches = patches.reshape(M, K)                      # (M, K) — no padding

    w2d = weight.reshape(E, K).T.astype(compute_dtype)   # (K, E), tiny copy
    b2d = bias.reshape(1, E).astype(jnp.float32)         # (1, E)

    # ---- pick tm: VMEM budget + guarantee >=2 (ideally >=4) grid steps ------
    sub = 16 if in_bytes < 4 else 8                      # sublane granularity
    resident = K * E * in_bytes + _round_up(E, 128) * 4  # weight + bias
    per_row = 2 * K * in_bytes + 2 * E * out_bytes       # double-buffered tiles
    cap = max((vmem_tile_budget_bytes - resident) // per_row, sub)
    cap = max((cap // sub) * sub, sub)
    tm_eff = min(_round_up(tm, sub), cap)
    if M >= 4 * 256:                                     # >=4 steps, tiles >=256
        tm_eff = min(tm_eff, _round_up(-(-M // 4), sub))
    elif M > 2 * sub:                                    # >=2 steps (megacore)
        tm_eff = min(tm_eff, _round_up(-(-M // 2), sub))
    tm_eff = max(sub, min(tm_eff, _round_up(M, sub)))

    grid_m = pl.cdiv(M, tm_eff)                          # partial last block OK

    vmem_need = (2 * tm_eff * K * in_bytes + 2 * tm_eff * E * out_bytes
                 + K * E * in_bytes + _round_up(E, 128) * 4)
    # Explicit scoped-VMEM limit: above v5e's 16 MiB default, capped at 48 MiB
    # so it stays comfortably inside v7x's 64 MiB physical VMEM.
    vmem_limit = int(min(max(vmem_need * 3 // 2 + (2 << 20), 24 << 20),
                         48 << 20))

    cost = pl.CostEstimate(
        flops=2 * M * K * E,
        transcendentals=0,
        bytes_accessed=(M * K * in_bytes + K * E * in_bytes + E * 4
                        + M * E * out_bytes),
    )

    out = pl.pallas_call(
        _patch_embed_kernel,
        out_shape=jax.ShapeDtypeStruct((M, E), out_dtype),
        grid=(grid_m,),
        in_specs=[
            pl.BlockSpec((tm_eff, K), lambda i: (i, 0)),   # patch tiles, pipelined
            pl.BlockSpec((K, E), lambda i: (0, 0)),        # weight: VMEM-resident
            pl.BlockSpec((1, E), lambda i: (0, 0)),        # bias:   VMEM-resident
        ],
        out_specs=pl.BlockSpec((tm_eff, E), lambda i: (i, 0)),
        compiler_params=pltpu.CompilerParams(
            dimension_semantics=("parallel",),             # megacore sharding
            allow_input_fusion=[True, False, False],       # fuse patchify DMA
            vmem_limit_bytes=vmem_limit,
        ),
        cost_estimate=cost,
    )(patches, w2d, b2d)

    return out.reshape(N, n_patches, E)


if __name__ == "__main__":
    # Small shapes consistent with the module: img_size=16, patch_size=4,
    # in_chans=4, embed_dim=32 -> n_patches = (16 // 4)**2 = 16.
    batch, in_chans, img_size, patch_size, embed_dim = 2, 4, 16, 4, 32

    key = jax.random.PRNGKey(0)
    kx, kw, kb = jax.random.split(key, 3)

    x = jax.random.normal(kx, (batch, in_chans, img_size, img_size), jnp.float32)
    # Synthetic conv parameters (shape = nn.Conv2d(in_chans, embed_dim, p, p))
    weight = jax.random.normal(
        kw, (embed_dim, in_chans, patch_size, patch_size), jnp.float32) * 0.05
    bias = jax.random.normal(kb, (embed_dim,), jnp.float32) * 0.01

    # Reference: plain-JAX strided conv (= PyTorch Conv2d with kernel=stride=p)
    ref_conv = jax.lax.conv_general_dilated(
        x, weight,
        window_strides=(patch_size, patch_size),
        padding="VALID",
        dimension_numbers=("NCHW", "OIHW", "NCHW"),
    ) + bias[None, :, None, None]
    n_patches = (img_size // patch_size) ** 2
    ref = ref_conv.reshape(batch, embed_dim, n_patches).transpose(0, 2, 1)

    # f32 compute path (jitted so the patchify fuses into the kernel DMA):
    pe_f32 = jax.jit(functools.partial(
        patch_embed, patch_size=patch_size, compute_dtype=jnp.float32))
    out_f32 = jax.block_until_ready(pe_f32(x, weight, bias))
    assert out_f32.shape == (batch, n_patches, embed_dim), out_f32.shape
    assert jnp.allclose(out_f32, ref, atol=1e-4, rtol=1e-4), \
        float(jnp.max(jnp.abs(out_f32 - ref)))

    # Default (bf16-compute, f32-out) production path: looser tolerance.
    pe_bf16 = jax.jit(functools.partial(patch_embed, patch_size=patch_size))
    out_bf16 = jax.block_until_ready(pe_bf16(x, weight, bias))
    assert out_bf16.shape == (batch, n_patches, embed_dim), out_bf16.shape
    assert jnp.allclose(out_bf16, ref, atol=5e-2, rtol=5e-2), \
        float(jnp.max(jnp.abs(out_bf16 - ref)))

    # bf16-output path (halves store traffic for bf16 downstream stacks).
    pe_bf16_out = jax.jit(functools.partial(
        patch_embed, patch_size=patch_size, out_dtype=jnp.bfloat16))
    out_b16o = jax.block_until_ready(pe_bf16_out(x, weight, bias))
    assert out_b16o.shape == (batch, n_patches, embed_dim), out_b16o.shape
    assert out_b16o.dtype == jnp.bfloat16
    assert jnp.allclose(out_b16o.astype(jnp.float32), ref, atol=1e-1, rtol=1e-1), \
        float(jnp.max(jnp.abs(out_b16o.astype(jnp.float32) - ref)))

    print("KERNEL_OK")
</pallas_src>

<mosaic_0001>
module attributes {stable_mosaic.version = 11 : i64} {
  func.func @_patch_embed_kernel(%arg0: i32, %arg1: memref<16x64xf32, #tpu.memory_space<vmem>>, %arg2: memref<64x32xf32, #tpu.memory_space<vmem>>, %arg3: memref<1x32xf32, #tpu.memory_space<vmem>>, %arg4: memref<16x32xf32, #tpu.memory_space<vmem>>) attributes {dimension_semantics = [#tpu.dimension_semantics<parallel>], iteration_bounds = array<i64: 2>, scalar_prefetch = 0 : i64, scratch_operands = 0 : i64, tpu.core_type = #tpu.core_type<tc>, window_params = [{transform_indices = @transform_0, window_bounds = array<i64: 16, 64>}, {pipeline_mode = #tpu.pipeline_mode<synchronous>, transform_indices = @transform_1, window_bounds = array<i64: 64, 32>}, {pipeline_mode = #tpu.pipeline_mode<synchronous>, transform_indices = @transform_2, window_bounds = array<i64: 1, 32>}, {transform_indices = @transform_3, window_bounds = array<i64: 16, 32>}]} {
    %c0 = arith.constant 0 : index
    %c0_0 = arith.constant 0 : index
    %0 = vector.load %arg1[%c0, %c0_0] : memref<16x64xf32, #tpu.memory_space<vmem>>, vector<16x64xf32>
    %c0_1 = arith.constant 0 : index
    %c0_2 = arith.constant 0 : index
    %1 = vector.load %arg2[%c0_1, %c0_2] : memref<64x32xf32, #tpu.memory_space<vmem>>, vector<64x32xf32>
    %cst = arith.constant dense<0.000000e+00> : vector<16x32xf32>
    %2 = tpu.matmul %0, %1, %cst {dimension_numbers = #tpu.dot_dimension_numbers<[1], [0], [0], [1], [0, 0, 1, 1], [], []>} : vector<16x64xf32>, vector<64x32xf32>, vector<16x32xf32> -> vector<16x32xf32>
    %c0_3 = arith.constant 0 : index
    %c0_4 = arith.constant 0 : index
    %3 = vector.load %arg3[%c0_3, %c0_4] : memref<1x32xf32, #tpu.memory_space<vmem>>, vector<1x32xf32>
    %4 = vector.broadcast %3 : vector<1x32xf32> to vector<16x32xf32>
    %5 = arith.addf %2, %4 : vector<16x32xf32>
    %c0_5 = arith.constant 0 : index
    %c0_6 = arith.constant 0 : index
    %6 = vector.load %arg4[%c0_5, %c0_6] : memref<16x32xf32, #tpu.memory_space<vmem>>, vector<16x32xf32>
    tpu.vector_store %arg4[%c0_5, %c0_6], %5 {strides = array<i32>} : memref<16x32xf32, #tpu.memory_space<vmem>>, vector<16x32xf32>,
    return
  }
  func.func @transform_0(%arg0: i32) -> (i32, i32) {
    %c0_i32 = arith.constant 0 : i32
    %c0_i32_0 = arith.constant 0 : i32
    return %arg0, %c0_i32 : i32, i32
  }
  func.func @transform_1(%arg0: i32) -> (i32, i32) {
    %c0_i32 = arith.constant 0 : i32
    %c0_i32_0 = arith.constant 0 : i32
    %c0_i32_1 = arith.constant 0 : i32
    return %c0_i32, %c0_i32_0 : i32, i32
  }
  func.func @transform_2(%arg0: i32) -> (i32, i32) {
    %c0_i32 = arith.constant 0 : i32
    %c0_i32_0 = arith.constant 0 : i32
    %c0_i32_1 = arith.constant 0 : i32
    return %c0_i32, %c0_i32_0 : i32, i32
  }
  func.func @transform_3(%arg0: i32) -> (i32, i32) {
    %c0_i32 = arith.constant 0 : i32
    %c0_i32_0 = arith.constant 0 : i32
    return %arg0, %c0_i32 : i32, i32
  }
}

</mosaic_0001>

<bundles_post_ra>
// kernel: patch_embed.1
= control target key start
LH: loop header
LB: loop body
LE: loop exit
PB: predicated region body
PF: predicated region fallthrough
CT: control target
= control target key end

     0   :  { %8 = vsyncpa [#allocation3], 0  ;;  %s559_s0 = inlined_call_operand.vmem [shape: f32[32,64], index: 0, kind: input, shape index: {}]   ;;  %s560_s1 = inlined_call_operand.vmem [shape: f32[64,32], index: 1, kind: input, shape index: {}]   ;;  %s561_s2 = inlined_call_operand.vmem [shape: f32[1,32], index: 2, kind: input, shape index: {}]   ;;  %s562_s3 = inlined_call_operand.hbm [shape: f32[32,32], index: 3, kind: output, shape index: {}]  }
   0x1   :  { %10 = vsyncpa [#allocation3 + $0x1], 0  ;;  %s448_s12 = smov 0   ;;  %s450_s13 = smov 0  }
   0x2   :  { %s452_s14 = smov 0   ;;  %s454_s15 = smov 0  }
   0x3 LB: > { %s469_s16 = sadd.s32 4294967295, %s424_s15   ;;  %s297_s17 = sadd.s32 4294967294, %s424_s15   ;;  %s424_s15 = sphi %s454_s15, %s568_s15   ;;  %s420_s14 = sphi %s452_s14, %s567_s14   ;;  %s416_s13 = sphi %s450_s13, %s566_s13   ;;  %s412_s12 = sphi %s448_s12, %s565_s12  }
   0x4   : > { %s473_s18 = sadd.s32 1, %s424_s15   ;;  %s91_s19 = sadd.s32 1, %s420_s14 }
   0x5   : > { %s88_s20 = ssub.s32 %s424_s15, %s473_s18  ;;  %p101_p0 = scmp.ne.s32.totalorder %s420_s14, %s416_s13 }
   0x6   : > { %p89_p1 = scmp.eq.s32.totalorder %s88_s20, 0  ;;  %p102_p2 = scmp.eq.s32.totalorder %s469_s16, 1 }
   0x7   : > { %p107_p3 = scmp.ne.s32.totalorder %s416_s13, %s412_s12  ;;  %p108_p4 = scmp.eq.s32.totalorder %s297_s17, 1 }
   0x8   : > { %s484_s21 = scalar_select %p89_p1, %s420_s14, %s91_s19  }
   0x9   : > { %p486_p5 = por %p102_p2, %p101_p0  ;;  %p490_p6 = por %p108_p4, %p107_p3 }
   0xa   : > { %p300_p7 = scmp.ge.s32.totalorder %s424_s15, 1  ;;  %p141_p8 = scmp.lt.s32.totalorder %s424_s15, 3 }
   0xc   : > { %p142_p9 = pnand %p300_p7, %p141_p8 }
   0xd   : > { %s302_s28 = sshll.u32 (!%p142_p9), %s469_s16, 1  ;;  %s162_s27 = sand.u32 (!%p142_p9), 1, %s416_s13  }
   0xe   : > { %145 = sbr.rel (%p142_p9) target bundleno = 168 (0xa8), region = 32  ;;  %p166_p10 = scmp.lt.s32.totalorder (!%p142_p9), %s302_s28, 3 }
   0xf   : > { %s311_s29 = sshll.u32 (!%p142_p9), %s469_s16, 4  ;;  %s220_s16 = scalar_lea.sflag (!%p142_p9), [#allocation3], %s162_s27 }
  0x10   : > { %s231_s5 = scalar_lea.hbm (!%p142_p9), %s562_s3, %s311_s29 }
  0x11   : > { %s234_s10 = sshll.u32 (!%p142_p9), %s231_s5, 4  ;;  %s235_s10 = int_to_ptr.hbm [resolvable:$true] %s234_s10 }
  0x12   : > { %s376_s11 = sshra.s32 (!%p142_p9), %s235_s10, 4  ;;  %s377_s11 = int_to_ptr.hbm [resolvable:$true] %s376_s11 }
  0x13   : > { %v181_v0 = vld [vmem:[%s560_s1 + $0x38] sm:$0xff]  ;;  %v180_v1 = vld [vmem:[%s560_s1 + $0x30] sm:$0xff]  ;;  %v179_v2 = vld [vmem:[%s560_s1 + $0x28] sm:$0xff]  ;;  %s570_s28 = smov (!%p166_p10, %s302_s28), 3  ;;  %vm186_vm0 = vcmask 523264   ;;  %vm216_vm1 = vcmask 261120   ;;  %p383_p0 = scmp.lt.s32.totalorder %s377_s11, %s562_s3 }
  0x14   : > { %201 = vmatpush.msra.mxu0 %v181_v0  ;;  %312 = vmatpush.msra.mxu1 %v181_v0  ;;  %v178_v3 = vld [vmem:[%s560_s1 + $0x20] sm:$0xff]  ;;  %v177_v4 = vld [vmem:[%s560_s1 + $0x18] sm:$0xff]  ;;  %s303_s8 = sshll.u32 %s570_s28, 3  ;;  %v176_v5 = vld [vmem:[%s560_s1 + $0x10] sm:$0xff]  ;;  %s301_s28 = sshll.u32 %s162_s27, 4 }
  0x15   : > { %v175_v6 = vld [vmem:[%s560_s1 + $0x8] sm:$0xff]  ;;  %s169_s24 = scalar_lea.vmem %s559_s0, %s303_s8  ;;  %v174_v7 = vld [vmem:[%s560_s1] sm:$0xff]  ;;  %s164_s8 = scalar_lea.vmem [#allocation2], %s301_s28 }
  0x16   : > { %202 = vmatpush.msra.mxu0 %v180_v1  ;;  %313 = vmatpush.msra.mxu1 %v180_v1  ;;  %v172_v8 = vld [vmem:[%s169_s24] sm:$0xff]  ;;  %v173_v9 = vld [vmem:[%s169_s24 + $0x8] sm:$0xff]  ;;  %s232_s9 = sshll.u32 %s164_s8, 4  ;;  %s378_s17 = scalar_lea.hbm %s377_s11, 16  ;;  %s233_s9 = int_to_ptr.vmem [resolvable:$true] %s232_s9 }
  0x17   : > { %v361_v10 = vld [vmem:[%s561_s2] ss:$0 sm:$0xff]  ;;  %p379_p11 = scmp.ne.s32.totalorder %s377_s11, %s378_s17  ;;  %s382_s24 = scalar_lea.hbm %s562_s3, 32 }
  0x18   : > { %203 = vmatpush.msra.mxu0 %v179_v2  ;;  %314 = vmatpush.msra.mxu1 %v179_v2  ;;  %p384_p1 = scmp.lt.s32.totalorder %s382_s24, %s378_s17 }
  0x19   : > { %p380_p12 = pnand %p379_p11, %p486_p5 }
  0x1a   : > { %204 = vmatpush.msra.mxu0 %v178_v3  ;;  %315 = vmatpush.msra.mxu1 %v178_v3  ;;  %p385_p2 = por %p384_p1, %p383_p0 }
  0x1b   : > { %p381_p13 = pneg %p380_p12 }
  0x1c   : > { %205 = vmatpush.msra.mxu0 %v177_v4  ;;  %316 = vmatpush.msra.mxu1 %v177_v4 }
  0x1d   : > { %p386_p3 = pnand %p385_p2, %p381_p13 }
  0x1e   : > { %206 = vmatpush.msra.mxu0 %v176_v5  ;;  %317 = vmatpush.msra.mxu1 %v176_v5 }
  0x20   : > { %207 = vmatpush.msra.mxu0 %v175_v6  ;;  %318 = vmatpush.msra.mxu1 %v175_v6 }
  0x22   : > { %208 = vmatpush.msra.mxu0 %v174_v7  ;;  %319 = vmatpush.msra.mxu1 %v174_v7 }
  0x23   : > { %304 = vmatmul.msk.f32.vlgmr.msra.gmra.mxu0 %vm186_vm0, %v172_v8  ;;  %305 = vmatmul.msk.f32.vlgmr.msra.gmra.mxu1 %vm186_vm0, %v173_v9 }
  0xa0   : > { %v210_v11 = vpop.f32.mrf.mxu0  ;;  %v213_v12 = vpop.f32.mrf.mxu1 }
  0xa1   : > { %v211_v13 = vadd.f32 %v361_v10, %v210_v11  ;;  %v214_v14 = vadd.f32 %v361_v10, %v213_v12 }
  0xa3   : > { %217 = vst.msk [vmem:[%s164_s8] sm:$0xff] %vm216_vm1, %v211_v13 }
  0xa4   : > { %218 = vst.msk [vmem:[%s164_s8 + $0x8] sm:$0xff] %vm216_vm1, %v214_v14 }
  0xa5   : > { %389 = shalt.err (!%p386_p3)
}
  0xa6   : > { %s426_s27 = smov 128   ;;  %s427_s28 = smov 8  }
  0xa7   : > { %320 = dma.vmem_to_hbm [thread:$0]  (%p486_p5), %s233_s9, 256, %s235_s10, %s220_s16, %s426_s27, %s426_s27, %s427_s28  }
  0xa8 PF: > { %p326_p4 = scmp.ge.s32.totalorder %s424_s15, 2  ;;  %s249_s29 = sand.u32 1, %s412_s12  }
  0xa9   : > { %s250_s30 = scalar_lea.sflag [#allocation3], %s249_s29 }
  0xaa   : > { %p323_p7 = pnand %p326_p4, %p490_p6 }
  0xac   : > { %p324_p8 = pneg %p323_p7 }
  0xae   : > { %407 = dma.done.wait (%p324_p8), %s250_s30, 256  }
  0xaf   : > { %409 = vsyncadd (%p324_p8), %s250_s30, 4294967040  ;;  %p13_p9 = scmp.ge.s32.totalorder %s473_s18, 4   ;;  %s565_s12 = smov %s416_s13 }
  0xb0   : > { %s566_s13 = smov %s420_s14  ;;  %s567_s14 = smov %s484_s21 }
  0xb1   : > { %s568_s15 = smov %s473_s18  ;;  %15 = sbr.rel (!%p13_p9) target bundleno = 3 (0x3), region = 67 }
  0xb6   :  { %256 = vsyncpa [#allocation3], 1 }
  0xb7   :  { %258 = vsyncpa [#allocation3 + $0x1], 1 }

</bundles_post_ra>
